<compile_context>
chip_gen: v5e
topology: v5e:2x2
jax: 0.10.0
libtpu: 0.0.40
codegen_flags: <defaults>
</compile_context>

<pallas_src>
import functools

import jax
import jax.numpy as jnp
from jax.experimental import pallas as pl
from jax.experimental.pallas import tpu as pltpu


_DEF_BLOCK_BYTES = 4 * 1024 * 1024      # target bytes per input block (f32 sizing)
_VMEM_LIMIT_BYTES = 32 * 1024 * 1024    # within scoped/physical VMEM on v5e/v6e/v7x


# ----------------------------------------------------------------------------
# Tiling helper
# ----------------------------------------------------------------------------
def _pick_tile(B, D, block_bytes):
    """Row tile `tb`: full batch if it fits, else the largest 8-multiple
    of rows within ~block_bytes (always >= 8)."""
    rows = block_bytes // max(1, D * 4)
    cap = max(8, (rows // 8) * 8)
    if B <= cap:
        return B                      # single full-extent block (grid=(1,))
    return cap


# ----------------------------------------------------------------------------
# Kernels
# ----------------------------------------------------------------------------
def _partial_sum_kernel(x_ref, y_ref, o_ref, *, squared, tb, valid_rows):
    """One independent partial sum per grid step (no resident accumulator,
    so the row axis stays 'parallel' / megacore-friendly). The partial is
    broadcast into an (8,128)-aligned block so stores are plain vst."""
    d = x_ref[...].astype(jnp.float32) - y_ref[...].astype(jnp.float32)
    s = d * d if squared else jnp.abs(d)
    row = jnp.sum(s, axis=1, keepdims=True)                   # (tb, 1) lane reduce
    if valid_rows is not None:                                 # static: ragged batch
        idx = pl.program_id(0) * tb + jax.lax.broadcasted_iota(
            jnp.int32, (tb, 1), 0)
        row = jnp.where(idx < valid_rows, row, 0.0)            # mask OOB garbage rows
    tot = jnp.sum(row, axis=0, keepdims=True)                  # (1, 1) sublane reduce
    o_ref[...] = jnp.broadcast_to(tot, o_ref.shape)            # (8, 128) aligned block


def _cosine_loss_kernel(x_ref, y_ref, o_ref):
    """Per-row 1 - cosine_similarity(x, y) along the feature (last) axis."""
    x = x_ref[...].astype(jnp.float32)
    y = y_ref[...].astype(jnp.float32)
    dot = jnp.sum(x * y, axis=-1, keepdims=True)               # (tb, 1)
    nx2 = jnp.sum(x * x, axis=-1, keepdims=True)
    ny2 = jnp.sum(y * y, axis=-1, keepdims=True)
    eps = 1e-8
    # cos = dot / max(|x|*|y|, eps) == dot * rsqrt(max(|x|^2*|y|^2, eps^2))
    inv = jax.lax.rsqrt(jnp.maximum(nx2 * ny2, eps * eps))     # EUP, not VPU sqrt+div
    o_ref[...] = 1.0 - dot * inv


# ----------------------------------------------------------------------------
# Wrappers
# ----------------------------------------------------------------------------
def _reduced_loss(x, y, *, squared, block_bytes):
    B, D = x.shape
    tb = _pick_tile(B, D, block_bytes)
    nb = pl.cdiv(B, tb)
    valid_rows = B if (B % tb) != 0 else None                  # static mask flag

    partials = pl.pallas_call(
        functools.partial(_partial_sum_kernel, squared=squared, tb=tb,
                          valid_rows=valid_rows),
        out_shape=jax.ShapeDtypeStruct((nb * 8, 128), jnp.float32),
        grid_spec=pltpu.PrefetchScalarGridSpec(
            num_scalar_prefetch=0,
            grid=(nb,),
            in_specs=[
                pl.BlockSpec((tb, D), lambda i: (i, 0)),
                pl.BlockSpec((tb, D), lambda i: (i, 0)),
            ],
            out_specs=pl.BlockSpec((8, 128), lambda i: (i, 0)),
        ),
        compiler_params=pltpu.CompilerParams(
            dimension_semantics=("parallel",),
            vmem_limit_bytes=_VMEM_LIMIT_BYTES,
        ),
    )(x, y)

    # Each (8, 128) block holds one broadcast partial; out-of-range rows were
    # masked in-kernel, so normalize by the TRUE element count B * D.
    per_block = partials.reshape(nb, 8, 128)[:, 0, 0]
    return jnp.sum(per_block) * (1.0 / float(B * D))


def _cosine_loss(x, y, *, block_bytes):
    B, D = x.shape
    tb = _pick_tile(B, D, block_bytes)
    nb = pl.cdiv(B, tb)

    out = pl.pallas_call(
        _cosine_loss_kernel,
        out_shape=jax.ShapeDtypeStruct((B, 1), jnp.float32),
        grid_spec=pltpu.PrefetchScalarGridSpec(
            num_scalar_prefetch=0,
            grid=(nb,),
            in_specs=[
                pl.BlockSpec((tb, D), lambda i: (i, 0)),
                pl.BlockSpec((tb, D), lambda i: (i, 0)),
            ],
            # Rows are independent; the trailing partial block's OOB writes
            # are discarded by Pallas, so no masking/padding is needed.
            out_specs=pl.BlockSpec((tb, 1), lambda i: (i, 0)),
        ),
        compiler_params=pltpu.CompilerParams(
            dimension_semantics=("parallel",),
            vmem_limit_bytes=_VMEM_LIMIT_BYTES,
        ),
    )(x, y)
    return out[:, 0]


def direction_loss(x, y, loss_type="mse", *, block_bytes=_DEF_BLOCK_BYTES):
    """JAX/Pallas equivalent of DirectionLoss(loss_type)(x, y) for (B, D) inputs."""
    if loss_type == "mse":
        return _reduced_loss(x, y, squared=True, block_bytes=block_bytes)
    if loss_type == "mae":
        return _reduced_loss(x, y, squared=False, block_bytes=block_bytes)
    if loss_type == "cosine":
        return _cosine_loss(x, y, block_bytes=block_bytes)
    raise ValueError(f"unknown loss_type: {loss_type}")


# ----------------------------------------------------------------------------
# Demo / self-check
# ----------------------------------------------------------------------------
if __name__ == "__main__":
    key = jax.random.PRNGKey(0)

    def check(B, D, block_bytes=_DEF_BLOCK_BYTES, dtype=jnp.float32):
        kx, ky = jax.random.split(jax.random.fold_in(key, B * 10007 + D))
        x = jax.random.normal(kx, (B, D), dtype=jnp.float32).astype(dtype)
        y = jax.random.normal(ky, (B, D), dtype=jnp.float32).astype(dtype)
        xf, yf = x.astype(jnp.float32), y.astype(jnp.float32)

        mse = jax.block_until_ready(
            direction_loss(x, y, "mse", block_bytes=block_bytes))
        mse_ref = jnp.mean((xf - yf) ** 2)
        assert jnp.allclose(mse, mse_ref, rtol=1e-5, atol=1e-5), (mse, mse_ref)

        mae = jax.block_until_ready(
            direction_loss(x, y, "mae", block_bytes=block_bytes))
        mae_ref = jnp.mean(jnp.abs(xf - yf))
        assert jnp.allclose(mae, mae_ref, rtol=1e-5, atol=1e-5), (mae, mae_ref)

        cos = jax.block_until_ready(
            direction_loss(x, y, "cosine", block_bytes=block_bytes))
        nx = jnp.linalg.norm(xf, axis=1)
        ny = jnp.linalg.norm(yf, axis=1)
        cos_ref = 1.0 - jnp.sum(xf * yf, axis=1) / jnp.maximum(nx * ny, 1e-8)
        assert cos.shape == (B,)
        assert jnp.allclose(cos, cos_ref, rtol=1e-5, atol=1e-5)

    # Small CLIP-direction-like batch: single full-array block, grid=(1,).
    check(16, 128)
    # Tiny block budget -> multi-block path with a ragged trailing block
    # (exercises the in-kernel row mask and discarded OOB writes).
    check(50, 192, block_bytes=16 * 1024)
    # Multi-block, evenly divisible (no mask code emitted).
    check(64, 256, block_bytes=32 * 1024)

    print("KERNEL_OK")
</pallas_src>

<mosaic_0001>
module attributes {stable_mosaic.version = 11 : i64} {
  func.func @_partial_sum_kernel(%arg0: i32, %arg1: memref<16x128xf32, #tpu.memory_space<vmem>>, %arg2: memref<16x128xf32, #tpu.memory_space<vmem>>, %arg3: memref<8x128xf32, #tpu.memory_space<vmem>>) attributes {dimension_semantics = [#tpu.dimension_semantics<parallel>], iteration_bounds = array<i64: 1>, scalar_prefetch = 0 : i64, scratch_operands = 0 : i64, tpu.core_type = #tpu.core_type<tc>, window_params = [{transform_indices = @transform_0, window_bounds = array<i64: 16, 128>}, {transform_indices = @transform_1, window_bounds = array<i64: 16, 128>}, {transform_indices = @transform_2, window_bounds = array<i64: 8, 128>}]} {
    %c0 = arith.constant 0 : index
    %c0_0 = arith.constant 0 : index
    %0 = vector.load %arg1[%c0, %c0_0] : memref<16x128xf32, #tpu.memory_space<vmem>>, vector<16x128xf32>
    %c0_1 = arith.constant 0 : index
    %c0_2 = arith.constant 0 : index
    %1 = vector.load %arg2[%c0_1, %c0_2] : memref<16x128xf32, #tpu.memory_space<vmem>>, vector<16x128xf32>
    %2 = arith.subf %0, %1 : vector<16x128xf32>
    %3 = arith.mulf %2, %2 : vector<16x128xf32>
    %cst = arith.constant dense<0.000000e+00> : vector<16xf32>
    %4 = vector.multi_reduction <add>, %3, %cst [1] : vector<16x128xf32> to vector<16xf32>
    %5 = vector.shape_cast %4 : vector<16xf32> to vector<16x1xf32>
    %cst_3 = arith.constant dense<0.000000e+00> : vector<1xf32>
    %6 = vector.multi_reduction <add>, %5, %cst_3 [0] : vector<16x1xf32> to vector<1xf32>
    %7 = vector.shape_cast %6 : vector<1xf32> to vector<1x1xf32>
    %8 = vector.shape_cast %7 : vector<1x1xf32> to vector<1x1xf32>
    %9 = vector.broadcast %8 : vector<1x1xf32> to vector<8x128xf32>
    %c0_4 = arith.constant 0 : index
    %c0_5 = arith.constant 0 : index
    %10 = vector.load %arg3[%c0_4, %c0_5] : memref<8x128xf32, #tpu.memory_space<vmem>>, vector<8x128xf32>
    tpu.vector_store %arg3[%c0_4, %c0_5], %9 {strides = array<i32>} : memref<8x128xf32, #tpu.memory_space<vmem>>, vector<8x128xf32>,
    return
  }
  func.func @transform_0(%arg0: i32) -> (i32, i32) {
    %c0_i32 = arith.constant 0 : i32
    %c0_i32_0 = arith.constant 0 : i32
    return %arg0, %c0_i32 : i32, i32
  }
  func.func @transform_1(%arg0: i32) -> (i32, i32) {
    %c0_i32 = arith.constant 0 : i32
    %c0_i32_0 = arith.constant 0 : i32
    return %arg0, %c0_i32 : i32, i32
  }
  func.func @transform_2(%arg0: i32) -> (i32, i32) {
    %c0_i32 = arith.constant 0 : i32
    %c0_i32_0 = arith.constant 0 : i32
    return %arg0, %c0_i32 : i32, i32
  }
}

</mosaic_0001>

<bundles_post_ra>
// kernel: tpu_custom_call.1
= control target key start
LH: loop header
LB: loop body
LE: loop exit
PB: predicated region body
PF: predicated region fallthrough
CT: control target
= control target key end

     0   :  { %7 = vsyncpa [#allocation3], 0  ;;  %s194_s0 = inlined_call_operand.hbm [shape: f32[16,128], index: 0, kind: input, shape index: {}]   ;;  %s195_s1 = inlined_call_operand.hbm [shape: f32[16,128], index: 1, kind: input, shape index: {}]   ;;  %s196_s2 = inlined_call_operand.hbm [shape: f32[8,128], index: 2, kind: output, shape index: {}]  }
   0x1   :  { %8 = vsyncpa [#allocation6], 0 }
   0x2   :  { %9 = vsyncpa [#allocation4], 0  ;;  %s14_s11 = sshll.u32 %s194_s0, 4  ;;  %s165_s12 = smov [#allocation2]   ;;  %s15_s11 = int_to_ptr.hbm [resolvable:$true] %s14_s11 }
   0x3   :  { %s16_s13 = sshll.u32 %s165_s12, 4  ;;  %s27_s16 = sshll.u32 %s195_s1, 4  ;;  %s17_s13 = int_to_ptr.vmem [resolvable:$true] %s16_s13  ;;  %s28_s16 = int_to_ptr.hbm [resolvable:$true] %s27_s16 }
   0x4   :  { %s166_s17 = smov 128   ;;  %s167_s18 = smov 8  }
   0x5   :  { %22 = dma.hbm_to_vmem [thread:$0]  %s15_s11, 256, %s17_s13, [#allocation3], %s166_s17, %s166_s17, %s167_s18  }
   0x6   :  { %s168_s19 = smov [#allocation5]  }
   0x7   :  { %s29_s20 = sshll.u32 %s168_s19, 4  ;;  %s30_s20 = int_to_ptr.vmem [resolvable:$true] %s29_s20 }
   0x8   :  { %35 = dma.hbm_to_vmem [thread:$0]  %s28_s16, 256, %s30_s20, [#allocation6], %s166_s17, %s166_s17, %s167_s18  }
   0x9   :  { %159 = dma.done.wait [#allocation3], 256  }
   0xa   :  { %160 = vsyncadd [#allocation3], 4294967040 }
   0xb   :  { %161 = dma.done.wait [#allocation6], 256  }
   0xc   :  { %162 = vsyncadd [#allocation6], 4294967040  ;;  %v44_v0 = vld [vmem:[#allocation2] sm:$0xff]  ;;  %v46_v1 = vld [vmem:[#allocation5] sm:$0xff]  ;;  %s169_s0 = smov [#allocation7]   ;;  %s71_s23 = sshll.u32 %s196_s2, 4  ;;  %s72_s23 = int_to_ptr.hbm [resolvable:$true] %s71_s23 }
   0xd   :  { %v48_v2 = vsub.f32 %v44_v0, %v46_v1  ;;  %v45_v3 = vld [vmem:[#allocation2 + $0x8] sm:$0xff]  ;;  %v47_v4 = vld [vmem:[#allocation5 + $0x8] sm:$0xff]  ;;  %s69_s1 = sshll.u32 %s169_s0, 4  ;;  %s70_s1 = int_to_ptr.vmem [resolvable:$true] %s69_s1 }
   0xe   :  { %v49_v6 = vsub.f32 %v45_v3, %v47_v4 }
   0xf   :  { %v50_v5 = vmul.f32 %v48_v2, %v48_v2 }
  0x10   :  { %v51_v7 = vmul.f32 %v49_v6, %v49_v6 }
  0x11   :  { %52 = vadd.xlane.f32.xlu0 %v50_v5 }
  0x19   :  { %54 = vadd.xlane.f32.xlu0 %v51_v7 }
  0x84   :  { %v53_v8 = vpop.xlane.xlu0 %52 }
  0x8c   :  { %v55_v9 = vpop.xlane.xlu0 %54 }
  0x8d   :  { %v56_v10 = vadd.f32 %v55_v9, %v53_v8 }
  0x8f   :  { %v57_v11 = vrot.slane %v56_v10, 4 }
  0x91   :  { %v58_v12 = vadd.f32 %v57_v11, %v56_v10 }
  0x93   :  { %v59_v13 = vrot.slane %v58_v12, 2 }
  0x95   :  { %v60_v14 = vadd.f32 %v59_v13, %v58_v12 }
  0x97   :  { %v61_v15 = vrot.slane %v60_v14, 1 }
  0x99   :  { %v62_v16 = vadd.f32 %v61_v15, %v60_v14 }
  0x9b   :  { %63 = vst [vmem:[#allocation7] sm:$0xff] %v62_v16 }
  0x9c   :  { %74 = dma.vmem_to_hbm [thread:$0]  %s70_s1, 128, %s72_s23, [#allocation4]  }
  0x9d   :  { %163 = dma.done.wait [#allocation4], 128  }
  0x9e   :  { %164 = vsyncadd [#allocation4], 4294967168 }
  0x9f   :  { %79 = vsyncpa [#allocation3], 1 }
  0xa0   :  { %80 = vsyncpa [#allocation6], 1 }
  0xa1   :  { %81 = vsyncpa [#allocation4], 1 }

</bundles_post_ra>
